<compile_context>
chip_gen: v5e
topology: v5e:2x2
jax: 0.10.0
libtpu: 0.0.40
codegen_flags: <defaults>
</compile_context>

<pallas_src>
import functools

import jax
import jax.numpy as jnp
from jax import lax
from jax.experimental import pallas as pl
from jax.experimental.pallas import tpu as pltpu

EPS = 1e-07
_LANES = 128


def _round_up(a, b):
    return (a + b - 1) // b * b


def _nce_kernel(x_ref, out_ref, *, k_plus_1, noise_const, n_valid, block_rows):
    """One (block_rows, 128) lane-dense tile -> (1, 128) partial sums."""
    pid = pl.program_id(0)
    x = x_ref[...].astype(jnp.float32)                        # (TB, 128)

    row = lax.broadcasted_iota(jnp.int32, x.shape, 0)
    lane = lax.broadcasted_iota(jnp.int32, x.shape, 1)
    flat = (pid * block_rows + row) * _LANES + lane           # global flat idx
    valid = flat < n_valid                                    # mask zero padding
    is_pos = (flat % k_plus_1) == 0                           # column 0 of x

    denom = x + (noise_const + EPS)
    numer = jnp.where(is_pos, x, noise_const)
    # log(0) = -inf for x[i,0] == 0, identical to the PyTorch reference.
    terms = jnp.where(valid, jnp.log(numer / denom), 0.0)

    # Sublane (XLU) reduction only; the cheap cross-lane/cross-block sum is
    # done in the wrapper on the (num_blocks, 128) partials.
    out_ref[...] = jnp.sum(terms, axis=0, keepdims=True)


def nce_criterion(x, targets, nLem, *, max_rows_per_block=512):
    """Pallas implementation of NCECriterion.forward.  `targets` is unused."""
    del targets  # not used by the reference forward pass
    batch, k_plus_1 = x.shape
    K = k_plus_1 - 1
    noise_const = float(K) / float(nLem)                      # K * Pn
    n = batch * k_plus_1

    rows = pl.cdiv(n, _LANES)
    block_rows = min(_round_up(int(max_rows_per_block), 8), _round_up(rows, 8))
    rows_p = _round_up(rows, block_rows)
    num_blocks = rows_p // block_rows

    # Lane-dense layout: flatten row-major, zero-pad, reshape to (rows_p, 128).
    x_flat = jnp.reshape(x, (-1,))
    pad = rows_p * _LANES - n
    if pad:
        x_flat = jnp.pad(x_flat, (0, pad))
    x2d = jnp.reshape(x_flat, (rows_p, _LANES))

    kernel = functools.partial(
        _nce_kernel,
        k_plus_1=k_plus_1,
        noise_const=noise_const,
        n_valid=n,
        block_rows=block_rows,
    )

    partials = pl.pallas_call(
        kernel,
        out_shape=jax.ShapeDtypeStruct((num_blocks, _LANES), jnp.float32),
        grid=(num_blocks,),
        in_specs=[pl.BlockSpec((block_rows, _LANES), lambda i: (i, 0))],
        out_specs=pl.BlockSpec((1, _LANES), lambda i: (i, 0)),
        compiler_params=pltpu.CompilerParams(
            dimension_semantics=("parallel",)),
        cost_estimate=pl.CostEstimate(
            flops=6 * n,
            transcendentals=n,
            bytes_accessed=rows_p * _LANES * x.dtype.itemsize
                           + num_blocks * _LANES * 4),
    )(x2d)

    # Final tiny reduction + global-batch normalization in the wrapper.
    return -jnp.sum(partials) / float(batch)


def nce_criterion_ref(x, targets, nLem):
    """Pure-JAX reference (mirrors the PyTorch code line by line)."""
    del targets
    B = x.shape[0]
    K = x.shape[1] - 1
    Pn = 1.0 / float(nLem)
    Pmt = x[:, 0]
    lnPmt = jnp.log(Pmt / (Pmt + (K * Pn + EPS)))
    Pon_div = x[:, 1:] + (K * Pn + EPS)
    lnPon = jnp.log((K * Pn) / Pon_div)
    return -(jnp.sum(lnPmt) + jnp.sum(lnPon)) / B


if __name__ == "__main__":
    key = jax.random.PRNGKey(0)

    # Small shapes consistent with the module: x = (batchSize, K+1) scores.
    batch, K, nLem = 8, 15, 4096
    kx, kt = jax.random.split(key)
    x = jax.random.uniform(kx, (batch, K + 1), dtype=jnp.float32,
                           minval=1e-4, maxval=1.0)
    targets = jax.random.randint(kt, (batch,), 0, nLem)

    loss = jax.block_until_ready(nce_criterion(x, targets, nLem))
    loss_ref = jax.block_until_ready(nce_criterion_ref(x, targets, nLem))
    assert jnp.allclose(loss, loss_ref, rtol=2e-5, atol=1e-5), (loss, loss_ref)

    # Second check exercising the multi-block grid + tail masking path.
    batch2, K2 = 100, 63
    kx2, kt2 = jax.random.split(kt)
    x2 = jax.random.uniform(kx2, (batch2, K2 + 1), dtype=jnp.float32,
                            minval=1e-4, maxval=1.0)
    targets2 = jax.random.randint(kt2, (batch2,), 0, nLem)
    loss2 = jax.block_until_ready(
        nce_criterion(x2, targets2, nLem, max_rows_per_block=8))
    loss2_ref = jax.block_until_ready(nce_criterion_ref(x2, targets2, nLem))
    assert jnp.allclose(loss2, loss2_ref, rtol=2e-5, atol=1e-4), (loss2, loss2_ref)

    print("KERNEL_OK")
</pallas_src>

<mosaic_0001>
module attributes {stable_mosaic.version = 11 : i64} {
  func.func @_nce_kernel(%arg0: i32, %arg1: memref<8x128xf32, #tpu.memory_space<vmem>>, %arg2: memref<1x128xf32, #tpu.memory_space<vmem>>) attributes {dimension_semantics = [#tpu.dimension_semantics<parallel>], iteration_bounds = array<i64: 1>, scalar_prefetch = 0 : i64, scratch_operands = 0 : i64, tpu.core_type = #tpu.core_type<tc>, window_params = [{transform_indices = @transform_0, window_bounds = array<i64: 8, 128>}, {transform_indices = @transform_1, window_bounds = array<i64: 1, 128>}]} {
    %c0 = arith.constant 0 : index
    %c0_0 = arith.constant 0 : index
    %0 = vector.load %arg1[%c0, %c0_0] : memref<8x128xf32, #tpu.memory_space<vmem>>, vector<8x128xf32>
    %1 = tpu.iota {dimensions = array<i32: 0>} : vector<8x128xi32>
    %2 = tpu.iota {dimensions = array<i32: 1>} : vector<8x128xi32>
    %c8_i32 = arith.constant 8 : i32
    %3 = arith.muli %arg0, %c8_i32 : i32
    %4 = vector.broadcast %3 : i32 to vector<8x128xi32>
    %5 = arith.addi %4, %1 : vector<8x128xi32>
    %c128_i32 = arith.constant 128 : i32
    %6 = vector.broadcast %c128_i32 : i32 to vector<8x128xi32>
    %7 = arith.muli %5, %6 : vector<8x128xi32>
    %8 = arith.addi %7, %2 : vector<8x128xi32>
    %c128_i32_1 = arith.constant 128 : i32
    %9 = vector.broadcast %c128_i32_1 : i32 to vector<8x128xi32>
    %10 = arith.cmpi slt, %8, %9 : vector<8x128xi32>
    %c16_i32 = arith.constant 16 : i32
    %c0_i32 = arith.constant 0 : i32
    %11 = arith.cmpi eq, %c16_i32, %c0_i32 : i32
    %c1_i32 = arith.constant 1 : i32
    %12 = arith.select %11, %c1_i32, %c16_i32 : i32
    %13 = vector.broadcast %12 : i32 to vector<8x128xi32>
    %14 = arith.remsi %8, %13 : vector<8x128xi32>
    %c0_i32_2 = arith.constant 0 : i32
    %15 = vector.broadcast %c0_i32_2 : i32 to vector<8x128xi32>
    %16 = arith.cmpi ne, %14, %15 : vector<8x128xi32>
    %c0_i32_3 = arith.constant 0 : i32
    %17 = vector.broadcast %c0_i32_3 : i32 to vector<8x128xi32>
    %18 = arith.cmpi slt, %14, %17 : vector<8x128xi32>
    %c0_i32_4 = arith.constant 0 : i32
    %19 = arith.cmpi slt, %12, %c0_i32_4 : i32
    %20 = vector.broadcast %19 : i1 to vector<8x128xi1>
    %21 = vector.broadcast %20 : vector<8x128xi1> to vector<8x128xi1>
    %22 = arith.xori %18, %21 : vector<8x128xi1>
    %23 = arith.andi %22, %16 : vector<8x128xi1>
    %24 = vector.broadcast %12 : i32 to vector<8x128xi32>
    %25 = arith.addi %14, %24 : vector<8x128xi32>
    %26 = arith.select %23, %25, %14 : vector<8x128xi1>, vector<8x128xi32>
    %c0_i32_5 = arith.constant 0 : i32
    %27 = vector.broadcast %c0_i32_5 : i32 to vector<8x128xi32>
    %28 = arith.cmpi eq, %26, %27 : vector<8x128xi32>
    %cst = arith.constant 0.00366220926 : f32
    %29 = vector.broadcast %cst : f32 to vector<8x128xf32>
    %30 = arith.addf %0, %29 : vector<8x128xf32>
    %cst_6 = arith.constant 0.00366210938 : f32
    %31 = vector.broadcast %cst_6 : f32 to vector<8x128xf32>
    %32 = arith.select %28, %0, %31 : vector<8x128xi1>, vector<8x128xf32>
    %33 = arith.divf %32, %30 : vector<8x128xf32>
    %34 = math.log %33 : vector<8x128xf32>
    %cst_7 = arith.constant 0.000000e+00 : f32
    %35 = vector.broadcast %cst_7 : f32 to vector<8x128xf32>
    %36 = arith.select %10, %34, %35 : vector<8x128xi1>, vector<8x128xf32>
    %cst_8 = arith.constant dense<0.000000e+00> : vector<128xf32>
    %37 = vector.multi_reduction <add>, %36, %cst_8 [0] : vector<8x128xf32> to vector<128xf32>
    %38 = vector.shape_cast %37 : vector<128xf32> to vector<1x128xf32>
    %c0_9 = arith.constant 0 : index
    %c0_10 = arith.constant 0 : index
    %39 = vector.load %arg2[%c0_9, %c0_10] : memref<1x128xf32, #tpu.memory_space<vmem>>, vector<1x128xf32>
    tpu.vector_store %arg2[%c0_9, %c0_10], %38 {strides = array<i32>} : memref<1x128xf32, #tpu.memory_space<vmem>>, vector<1x128xf32>,
    return
  }
  func.func @transform_0(%arg0: i32) -> (i32, i32) {
    %c0_i32 = arith.constant 0 : i32
    %c0_i32_0 = arith.constant 0 : i32
    return %arg0, %c0_i32 : i32, i32
  }
  func.func @transform_1(%arg0: i32) -> (i32, i32) {
    %c0_i32 = arith.constant 0 : i32
    %c0_i32_0 = arith.constant 0 : i32
    return %arg0, %c0_i32 : i32, i32
  }
}

</mosaic_0001>

<bundles_post_ra>
// kernel: tpu_custom_call.1
= control target key start
LH: loop header
LB: loop body
LE: loop exit
PB: predicated region body
PF: predicated region fallthrough
CT: control target
= control target key end

     0   :  { %6 = vsyncpa [#allocation3], 0  ;;  %s167_s0 = inlined_call_operand.hbm [shape: f32[8,128], index: 0, kind: input, shape index: {}]   ;;  %s168_s1 = inlined_call_operand.hbm [shape: f32[1,128], index: 1, kind: output, shape index: {}]  }
   0x1   :  { %7 = vsyncpa [#allocation4], 0  ;;  %s13_s8 = sshll.u32 %s167_s0, 4  ;;  %s149_s9 = smov [#allocation2]   ;;  %s14_s8 = int_to_ptr.hbm [resolvable:$true] %s13_s8 }
   0x2   :  { %s15_s10 = sshll.u32 %s149_s9, 4  ;;  %s16_s10 = int_to_ptr.vmem [resolvable:$true] %s15_s10 }
   0x3   :  { %18 = dma.hbm_to_vmem [thread:$0]  %s14_s8, 128, %s16_s10, [#allocation3]  }
   0x4   :  { %145 = dma.done.wait [#allocation3], 128  }
   0x5   :  { %146 = vsyncadd [#allocation3], 4294967168  ;;  %v24_v0 = vlaneseq  ;;  %v23_v5 = vld [vmem:[#allocation2] sm:$0xff]  ;;  %s150_s0 = smov [#allocation5]   ;;  %s81_s14 = sshll.u32 %s168_s1, 4  ;;  %s82_s14 = int_to_ptr.hbm [resolvable:$true] %s81_s14 }
   0x6   :  { %v47_v7 = vadd.f32 0.0036622093, %v23_v5  ;;  %s79_s11 = sshll.u32 %s150_s0, 4  ;;  %s80_s11 = int_to_ptr.vmem [resolvable:$true] %s79_s11 }
   0x7   :  { %v25_v1 = vshrl.u32 %v24_v0, 7  ;;  %v27_v2 = vand.u32 127, %v24_v0 }
   0x8   :  { %93 = vrcp.f32 %v47_v7  ;;  %v60_v16 = vand.u32 2147483648, %v47_v7  ;;  %vm54_vm4 = vweird.f32 %v47_v7  ;;  %v58_v18 = vand.u32 2147483647, %v47_v7 }
   0x9   :  { %v31_v3 = vmul.u32 128, %v25_v1 }
   0xa   :  { %v61_v20 = vor.u32 1.1754944e-38, %v60_v16  ;;  %vm59_vm8 = vcmp.eq.f32.partialorder %v58_v18, 8.507059e+37 }
   0xb   :  { %v32_v4 = vadd.s32 %v31_v3, %v27_v2 }
   0xd   :  { %vm34_vm0 = vcmp.lt.s32.totalorder %v32_v4, 0  ;;  %v35_v6 = vsub.s32 0, %v32_v4  ;;  %vm33_vm9 = vcmp.lt.s32.totalorder %v32_v4, 128 }
   0xe   :  { %v94_v12 = vpop.eup %93 }
   0xf   :  { %v36_v8 = vsel %vm34_vm0, %v35_v6, %v32_v4  ;;  %v50_v14 = vmul.f32 %v94_v12, %v47_v7  ;;  %vm55_vm5 = vweird.f32 %v94_v12 }
  0x10   :  { %v38_v9 = vand.u32 15, %v36_v8  ;;  %vm56_vm7 = vmor %vm54_vm4, %vm55_vm5 }
  0x11   :  { %v51_v17 = vsub.f32 1.0, %v50_v14 }
  0x12   :  { %v39_v10 = vsub.s32 0, %v38_v9 }
  0x13   :  { %v52_v19 = vmul.f32 %v94_v12, %v51_v17 }
  0x14   :  { %v40_v11 = vsel %vm34_vm0, %v39_v10, %v38_v9 }
  0x15   :  { %vm41_vm1 = vcmp.ne.s32.totalorder %v40_v11, 0  ;;  %vm42_vm2 = vcmp.lt.s32.totalorder %v40_v11, 0  ;;  %v44_v13 = vadd.s32 16, %v40_v11  ;;  %v53_v21 = vadd.f32 %v94_v12, %v52_v19 }
  0x16   :  { %vm43_vm3 = vmand %vm42_vm2, %vm41_vm1 }
  0x17   :  { %v45_v15 = vsel %vm43_vm3, %v44_v13, %v40_v11  ;;  %v57_v23 = vsel %vm56_vm7, %v94_v12, %v53_v21 }
  0x18   :  { %vm46_vm6 = vcmp.eq.s32.totalorder %v45_v15, 0  ;;  %v62_v24 = vsel %vm59_vm8, %v61_v20, %v57_v23 }
  0x19   :  { %v48_v22 = vsel %vm46_vm6, %v23_v5, 0.0036621094 }
  0x1a   :  { %v63_v25 = vmul.f32 %v62_v24, %v48_v22 }
  0x1c   :  { %95 = vlog2.f32 %v63_v25 }
  0x22   :  { %v96_v26 = vpop.eup %95 }
  0x23   :  { %v65_v27 = vmul.f32 0.6931472, %v96_v26 }
  0x25   :  { %v66_v28 = vsel %vm33_vm9, %v65_v27, 0.0 }
  0x26   :  { %v67_v29 = vrot.slane %v66_v28, 4 }
  0x28   :  { %v68_v30 = vadd.f32 %v67_v29, %v66_v28 }
  0x2a   :  { %v69_v31 = vrot.slane %v68_v30, 2 }
  0x2c   :  { %v70_v32 = vadd.f32 %v69_v31, %v68_v30 }
  0x2e   :  { %v71_v33 = vrot.slane %v70_v32, 1 }
  0x30   :  { %v72_v34 = vadd.f32 %v71_v33, %v70_v32 }
  0x32   :  { %73 = vst [vmem:[#allocation5] sm:$0x1] %v72_v34 }
  0x33   :  { %84 = dma.vmem_to_hbm [thread:$0]  %s80_s11, 16, %s82_s14, [#allocation4]  }
  0x34   :  { %147 = dma.done.wait [#allocation4], 16  }
  0x35   :  { %148 = vsyncadd [#allocation4], 4294967280 }
  0x36   :  { %89 = vsyncpa [#allocation3], 1 }
  0x37   :  { %90 = vsyncpa [#allocation4], 1 }

</bundles_post_ra>
